<compile_context>
chip_gen: v7x
topology: tpu7x:2x2x1
jax: 0.10.0
libtpu: 0.0.40
codegen_flags: <defaults>
</compile_context>

<pallas_src>
import numpy as np
import jax
import jax.numpy as jnp
from jax import lax
from jax.experimental import pallas as pl
from jax.experimental.pallas import tpu as pltpu

# ---- static config (mirrors configs.projector / configs.encoder.prompt) ----
VOCAB      = 33                      # ESM alphabet size (stub embedding table)
VOCAB_P    = 128                     # one-hot width (lane-dense); ids >= VOCAB map to zero rows
SENTINEL   = VOCAB                   # id used for all padding positions -> zero embedding
EMBED_DIM  = 32                      # esm2.embed_dim -> CNN in_channels
OUT_CH     = 8                       # configs.projector.out_channels
K_SIZES    = (3, 5)                  # configs.projector.kernel_sizes
C1         = OUT_CH * len(K_SIZES)   # concat channel count (16)
OUTPUT_DIM = 4                       # configs.projector.output_dim
NUM_TASKS  = 2                       # configs.encoder.prompt.num_tasks
NOUT       = NUM_TASKS * OUTPUT_DIM  # packed head width (8)
KMAX       = max(K_SIZES)            # fused tap count (5)
MAX_PAD    = (KMAX - 1) // 2         # 'same' padding for the widest kernel (2)
BN_EPS     = 1e-5
COMPUTE_DT = jnp.bfloat16            # matmul operand dtype (f32 accumulation)

assert NOUT <= C1, "packed head bias must fit in the (C1, 4) shift table"


# ----------------------------- Pallas kernel ---------------------------------
def _encoder_kernel(idc_ref,   # (1, KMAX, N) int32  tap-shifted, sentinel-padded id columns
                    ew1_ref,   # (KMAX, C1, VOCAB_P) bf16  embedding @ fused conv1 (BN folded)
                    w2_ref,    # (KMAX, C1, C1)      bf16  fused conv2 (BN folded), channel-first
                    wh_ref,    # (C1, C1)            bf16  MLP hidden Linear (BN folded)
                    wt_ref,    # (NOUT, C1)          bf16  packed task heads
                    sv_ref,    # (C1, 4)  f32 packed shifts: [bn1, bn2, bnh, head bias (padded)]
                    mask_ref,  # (1, N)   f32 validity mask (re-imposes 'same' zero padding)
                    out_ref):  # (1, NOUT, N) f32  channel-first, lane-dense output slab
    N = out_ref.shape[2]
    cdt = ew1_ref.dtype
    idc = idc_ref[0]                                           # (KMAX, N)
    sv = sv_ref[...]                                           # (C1, 4)
    vals = lax.broadcasted_iota(jnp.int32, (VOCAB_P, N), 0)    # sublane index for one-hot

    # --- stage 1: embedding lookup + fused multi-scale Conv1d + BN scale, all in 5 deep-K
    #     (K=128) MXU matmuls over per-tap one-hots; no shifted activation slices.
    acc1 = None
    for t in range(KMAX):
        oh = (idc[t:t + 1, :] == vals).astype(cdt)             # (VOCAB_P, N) one-hot column form
        m = jnp.dot(ew1_ref[t], oh, preferred_element_type=jnp.float32)    # (C1, N)
        acc1 = m if acc1 is None else acc1 + m
    # BN shift + ReLU (Dropout = eval identity), then re-zero pad positions ('same' padding)
    h1 = jnp.maximum(acc1 + sv[:, 0:1], 0.0) * mask_ref[...]   # (C1, N) f32

    # --- stage 2: fused multi-scale Conv1d -> BN -> ReLU; tap shifts are lane rolls (XLU)
    acc2 = jnp.dot(w2_ref[MAX_PAD], h1.astype(cdt), preferred_element_type=jnp.float32)
    for t in range(KMAX):
        if t == MAX_PAD:
            continue
        shifted = pltpu.roll(h1, shift=(MAX_PAD - t) % N, axis=1)
        acc2 = acc2 + jnp.dot(w2_ref[t], shifted.astype(cdt),
                              preferred_element_type=jnp.float32)
    h2 = jnp.maximum(acc2 + sv[:, 1:2], 0.0)                   # (C1, N) f32

    # --- MoBYMLP_multihead: Linear -> BN1d -> ReLU, then all task heads in one matmul
    z = jnp.maximum(jnp.dot(wh_ref[...], h2.astype(cdt),
                            preferred_element_type=jnp.float32) + sv[:, 2:3], 0.0)
    out = jnp.dot(wt_ref[...], z.astype(cdt),
                  preferred_element_type=jnp.float32) + sv[:NOUT, 3:4]
    out_ref[0] = out.astype(out_ref.dtype)                     # lane-dense (NOUT, N) store


# -------------------- trace-time parameter folding (glue) --------------------
def _round_up(x, m):
    return -(-x // m) * m


def _fuse_taps(ws, bs):
    """Merge the per-kernel-size conv branches into one KMAX-tap weight (k, Cin, Cout_total)."""
    cin = ws[0].shape[1]
    cout = sum(w.shape[2] for w in ws)
    wf = jnp.zeros((KMAX, cin, cout), jnp.float32)
    col = 0
    for w in ws:
        k, _, oc = w.shape
        off = (KMAX - k) // 2                      # center smaller kernels in the 5-tap frame
        wf = wf.at[off:off + k, :, col:col + oc].set(w)
        col += oc
    return wf, jnp.concatenate(bs)


@jax.jit
def encoder_ssptm_pallas(input_ids, params):
    """input_ids: (B, S) int tokens (BOS/EOS included); returns NUM_TASKS x (B, S-2, OUTPUT_DIM)."""
    B, S = input_ids.shape
    L = S - 2
    Lp = L + 2 * MAX_PAD

    # ---- fold embedding table + conv bias + eval-BN into channel-first bf16 weights ----
    emb_ext = jnp.zeros((VOCAB_P, EMBED_DIM), jnp.float32).at[:VOCAB].set(params['tok_emb'])
    w1f, b1 = _fuse_taps([params['w1a'], params['w1b']], [params['b1a'], params['b1b']])
    w2f, b2 = _fuse_taps([params['w2a'], params['w2b']], [params['b2a'], params['b2b']])
    s1 = params['g1'] / jnp.sqrt(params['v1'] + BN_EPS)
    s2 = params['g2'] / jnp.sqrt(params['v2'] + BN_EPS)
    sh = params['gh'] / jnp.sqrt(params['vh'] + BN_EPS)
    ew1 = (s1[None, :, None] *
           jnp.einsum('ve,kec->kcv', emb_ext, w1f)).astype(COMPUTE_DT)      # (K, C1, VOCAB_P)
    w2t = (s2[None, :, None] * jnp.transpose(w2f, (0, 2, 1))).astype(COMPUTE_DT)  # (K, C1, C1)
    wht = (sh[:, None] * params['wh'].T).astype(COMPUTE_DT)                       # (C1, C1)
    wtt = jnp.concatenate([params['wt'][i].T for i in range(NUM_TASKS)],
                          axis=0).astype(COMPUTE_DT)                              # (NOUT, C1)
    t1 = (b1 - params['m1']) * s1 + params['be1']
    t2 = (b2 - params['m2']) * s2 + params['be2']
    th = (params['bh'] - params['mh']) * sh + params['beh']
    bt = jnp.pad(params['bt'].reshape(-1), (0, C1 - NOUT))
    sv = jnp.stack([t1, t2, th, bt], axis=1)                   # (C1, 4) packed per-channel shifts

    # ---- tile sizing from a VMEM budget (lane padding included), >=2 grid steps when B>=2 ----
    bytes_per_pos = 1536          # ids + one-hot transient + f32 stage buffers + double buffers
    vmem_budget = 12 * 1024 * 1024
    bt_budget = max(1, vmem_budget // (bytes_per_pos * Lp))
    Bt = max(1, min(B, bt_budget))
    if B >= 2:
        Bt = min(Bt, -(-B // 2))  # at least 2 grid steps so a 2-TC chip (v7x) can split the batch
    num_tiles = -(-B // Bt)
    N0 = Bt * Lp
    N = _round_up(N0, 128)        # lane-dense slabs: unmasked stores, aligned lane rolls
    # TODO(synk): for sequences where one padded row alone exceeds the VMEM budget, the position
    # axis also needs tiling (with a MAX_PAD halo per tile); not required at these sizes.

    # ---- int32 id slab: per-row 'same' padding, batch padding and tap shifts on 4-byte ids ----
    ids = input_ids[:, 1:-1].astype(jnp.int32)                 # drop BOS / EOS positions
    rows = jnp.full((num_tiles * Bt, Lp), SENTINEL, jnp.int32)
    rows = rows.at[:B, MAX_PAD:MAX_PAD + L].set(ids)
    flat = jnp.full((num_tiles, N + 2 * MAX_PAD), SENTINEL, jnp.int32)
    flat = flat.at[:, MAX_PAD:MAX_PAD + N0].set(rows.reshape(num_tiles, N0))
    ids_taps = jnp.stack([flat[:, t:t + N] for t in range(KMAX)], axis=1)   # (T, KMAX, N)

    # ---- validity mask: trace-time constant (static L, Lp, N), passed as a (1, N) input ----
    pos = np.arange(N)
    valid = (pos < N0) & ((pos % Lp) >= MAX_PAD) & ((pos % Lp) < MAX_PAD + L)
    mask = jnp.asarray(valid.astype(np.float32)).reshape(1, N)

    out = pl.pallas_call(
        _encoder_kernel,
        out_shape=jax.ShapeDtypeStruct((num_tiles, NOUT, N), jnp.float32),
        grid_spec=pltpu.PrefetchScalarGridSpec(
            num_scalar_prefetch=0,
            grid=(num_tiles,),
            in_specs=[
                pl.BlockSpec((1, KMAX, N), lambda g: (g, 0, 0)),
                pl.BlockSpec(ew1.shape, lambda g: (0, 0, 0)),
                pl.BlockSpec(w2t.shape, lambda g: (0, 0, 0)),
                pl.BlockSpec(wht.shape, lambda g: (0, 0)),
                pl.BlockSpec(wtt.shape, lambda g: (0, 0)),
                pl.BlockSpec(sv.shape, lambda g: (0, 0)),
                pl.BlockSpec(mask.shape, lambda g: (0, 0)),
            ],
            out_specs=pl.BlockSpec((1, NOUT, N), lambda g: (g, 0, 0)),
        ),
        compiler_params=pltpu.CompilerParams(
            dimension_semantics=("parallel",),
            vmem_limit_bytes=48 * 1024 * 1024),
    )(ids_taps, ew1, w2t, wht, wtt, sv, mask)

    # ---- layout plumbing: channel-first lane-dense slab -> per-task (B, L, OUTPUT_DIM) ----
    out = out[:, :, :N0].reshape(num_tiles, NOUT, Bt, Lp)
    out = jnp.transpose(out, (0, 2, 3, 1)).reshape(num_tiles * Bt, Lp, NOUT)
    out = out[:B, MAX_PAD:MAX_PAD + L, :].reshape(B, L, NUM_TASKS, OUTPUT_DIM)
    return [out[:, :, i, :] for i in range(NUM_TASKS)]


def encoder_ssptm_forward(input_ids, task_ids, params):
    # TODO(synk): the pretrained ESM2 adapter-H / prefix-tuning backbone
    # (prepare_adapter_h_model, get_task_embedding, .pt task tokens) has no Pallas equivalent;
    # it is stubbed by a deterministic token-embedding lookup standing in for
    # esm2(...)['representations'][num_layers], folded into the stage-1 conv weights in-kernel.
    del task_ids
    return encoder_ssptm_pallas(input_ids, params)


# ------------------------- deterministic parameters --------------------------
def init_params(key):
    ks = jax.random.split(key, 20)
    n = lambda k, shape, s=0.1: (jax.random.normal(k, shape, jnp.float32) * s)
    p = {}
    p['tok_emb'] = n(ks[0], (VOCAB, EMBED_DIM), 0.5)
    # stage-1 convs (kernel sizes 3 and 5), weights stored (k, C_in, C_out)
    p['w1a'] = n(ks[1], (K_SIZES[0], EMBED_DIM, OUT_CH)); p['b1a'] = n(ks[2], (OUT_CH,))
    p['w1b'] = n(ks[3], (K_SIZES[1], EMBED_DIM, OUT_CH)); p['b1b'] = n(ks[4], (OUT_CH,))
    p['g1'] = 1.0 + n(ks[5], (C1,)); p['be1'] = n(ks[6], (C1,))
    p['m1'] = jnp.zeros((C1,), jnp.float32); p['v1'] = jnp.ones((C1,), jnp.float32)
    # stage-2 convs
    p['w2a'] = n(ks[7], (K_SIZES[0], C1, OUT_CH)); p['b2a'] = n(ks[8], (OUT_CH,))
    p['w2b'] = n(ks[9], (K_SIZES[1], C1, OUT_CH)); p['b2b'] = n(ks[10], (OUT_CH,))
    p['g2'] = 1.0 + n(ks[11], (C1,)); p['be2'] = n(ks[12], (C1,))
    p['m2'] = jnp.zeros((C1,), jnp.float32); p['v2'] = jnp.ones((C1,), jnp.float32)
    # MoBYMLP_multihead (num_layers=2): Linear(C1, C1) + BN + ReLU, then per-task heads
    p['wh'] = n(ks[13], (C1, C1)); p['bh'] = n(ks[14], (C1,))
    p['gh'] = 1.0 + n(ks[15], (C1,)); p['beh'] = n(ks[16], (C1,))
    p['mh'] = jnp.zeros((C1,), jnp.float32); p['vh'] = jnp.ones((C1,), jnp.float32)
    p['wt'] = n(ks[17], (NUM_TASKS, C1, OUTPUT_DIM)); p['bt'] = n(ks[18], (NUM_TASKS, OUTPUT_DIM))
    return p


# -------------------------- plain-JAX reference ------------------------------
def reference_forward(input_ids, params):
    features = params['tok_emb'][input_ids]
    x = features[:, 1:-1, :]

    def conv(x, w, b):
        y = lax.conv_general_dilated(x, w, window_strides=(1,), padding='SAME',
                                     dimension_numbers=('NWC', 'WIO', 'NWC'))
        return y + b

    def bn(x, g, be, m, v):
        return (x - m) / jnp.sqrt(v + BN_EPS) * g + be

    h1 = jnp.concatenate([conv(x, params['w1a'], params['b1a']),
                          conv(x, params['w1b'], params['b1b'])], axis=-1)
    h1 = jax.nn.relu(bn(h1, params['g1'], params['be1'], params['m1'], params['v1']))
    h2 = jnp.concatenate([conv(h1, params['w2a'], params['b2a']),
                          conv(h1, params['w2b'], params['b2b'])], axis=-1)
    h2 = jax.nn.relu(bn(h2, params['g2'], params['be2'], params['m2'], params['v2']))
    B, L, _ = h2.shape
    z = h2.reshape(-1, C1) @ params['wh'] + params['bh']
    z = jax.nn.relu(bn(z, params['gh'], params['beh'], params['mh'], params['vh']))
    return [(z @ params['wt'][i] + params['bt'][i]).reshape(B, L, OUTPUT_DIM)
            for i in range(NUM_TASKS)]


# ----------------------------------- main -------------------------------------
if __name__ == "__main__":
    key = jax.random.PRNGKey(0)
    pkey, dkey = jax.random.split(key)
    params = init_params(pkey)

    B, S = 2, 16                                    # seq with BOS/EOS -> L = 14 after slicing
    input_ids = jax.random.randint(dkey, (B, S), 0, VOCAB)
    task_ids = jnp.zeros((B,), jnp.int32)

    outs = encoder_ssptm_forward(input_ids, task_ids, params)
    outs = jax.block_until_ready(outs)

    refs = reference_forward(input_ids, params)
    for o, r in zip(outs, refs):
        assert o.shape == (B, S - 2, OUTPUT_DIM)
        # bf16 matmul operands (f32 accumulation) -> 2e-2 tolerance
        np.testing.assert_allclose(np.asarray(o), np.asarray(r), rtol=2e-2, atol=2e-2)

    print("KERNEL_OK")
</pallas_src>

<mosaic_0001>
module attributes {stable_mosaic.version = 11 : i64} {
  func.func @_encoder_kernel(%arg0: i32, %arg1: memref<1x5x128xi32, #tpu.memory_space<vmem>>, %arg2: memref<5x16x128xbf16, #tpu.memory_space<vmem>>, %arg3: memref<5x16x16xbf16, #tpu.memory_space<vmem>>, %arg4: memref<16x16xbf16, #tpu.memory_space<vmem>>, %arg5: memref<8x16xbf16, #tpu.memory_space<vmem>>, %arg6: memref<16x4xf32, #tpu.memory_space<vmem>>, %arg7: memref<1x128xf32, #tpu.memory_space<vmem>>, %arg8: memref<1x8x128xf32, #tpu.memory_space<vmem>>) attributes {dimension_semantics = [#tpu.dimension_semantics<parallel>], iteration_bounds = array<i64: 2>, scalar_prefetch = 0 : i64, scratch_operands = 0 : i64, tpu.core_type = #tpu.core_type<tc>, window_params = [{transform_indices = @transform_0, window_bounds = array<i64: 1, 5, 128>}, {pipeline_mode = #tpu.pipeline_mode<synchronous>, transform_indices = @transform_1, window_bounds = array<i64: 5, 16, 128>}, {pipeline_mode = #tpu.pipeline_mode<synchronous>, transform_indices = @transform_2, window_bounds = array<i64: 5, 16, 16>}, {pipeline_mode = #tpu.pipeline_mode<synchronous>, transform_indices = @transform_3, window_bounds = array<i64: 16, 16>}, {pipeline_mode = #tpu.pipeline_mode<synchronous>, transform_indices = @transform_4, window_bounds = array<i64: 8, 16>}, {pipeline_mode = #tpu.pipeline_mode<synchronous>, transform_indices = @transform_5, window_bounds = array<i64: 16, 4>}, {pipeline_mode = #tpu.pipeline_mode<synchronous>, transform_indices = @transform_6, window_bounds = array<i64: 1, 128>}, {transform_indices = @transform_7, window_bounds = array<i64: 1, 8, 128>}]} {
    %c0 = arith.constant 0 : index
    %c0_0 = arith.constant 0 : index
    %c0_1 = arith.constant 0 : index
    %0 = vector.load %arg1[%c0, %c0_0, %c0_1] : memref<1x5x128xi32, #tpu.memory_space<vmem>>, vector<1x5x128xi32>
    %1 = vector.shape_cast %0 : vector<1x5x128xi32> to vector<5x128xi32>
    %c0_2 = arith.constant 0 : index
    %c0_3 = arith.constant 0 : index
    %2 = vector.load %arg6[%c0_2, %c0_3] : memref<16x4xf32, #tpu.memory_space<vmem>>, vector<16x4xf32>
    %3 = tpu.iota {dimensions = array<i32: 0>} : vector<128x128xi32>
    %4 = vector.extract_strided_slice %1 {offsets = [0, 0], sizes = [1, 128], strides = [1, 1]} : vector<5x128xi32> to vector<1x128xi32>
    %5 = vector.broadcast %4 : vector<1x128xi32> to vector<128x128xi32>
    %6 = arith.cmpi eq, %5, %3 : vector<128x128xi32>
    %7 = arith.extui %6 : vector<128x128xi1> to vector<128x128xi32>
    %8 = arith.sitofp %7 : vector<128x128xi32> to vector<128x128xf32>
    %9 = arith.truncf %8 : vector<128x128xf32> to vector<128x128xbf16>
    %c0_4 = arith.constant 0 : index
    %c0_5 = arith.constant 0 : index
    %c0_6 = arith.constant 0 : index
    %10 = vector.load %arg2[%c0_4, %c0_5, %c0_6] : memref<5x16x128xbf16, #tpu.memory_space<vmem>>, vector<1x16x128xbf16>
    %11 = vector.shape_cast %10 : vector<1x16x128xbf16> to vector<16x128xbf16>
    %cst = arith.constant dense<0.000000e+00> : vector<16x128xf32>
    %12 = tpu.matmul %11, %9, %cst {dimension_numbers = #tpu.dot_dimension_numbers<[1], [0], [0], [1], [0, 0, 1, 1], [], []>} : vector<16x128xbf16>, vector<128x128xbf16>, vector<16x128xf32> -> vector<16x128xf32>
    %13 = vector.extract_strided_slice %1 {offsets = [1, 0], sizes = [1, 128], strides = [1, 1]} : vector<5x128xi32> to vector<1x128xi32>
    %14 = vector.broadcast %13 : vector<1x128xi32> to vector<128x128xi32>
    %15 = arith.cmpi eq, %14, %3 : vector<128x128xi32>
    %16 = arith.extui %15 : vector<128x128xi1> to vector<128x128xi32>
    %17 = arith.sitofp %16 : vector<128x128xi32> to vector<128x128xf32>
    %18 = arith.truncf %17 : vector<128x128xf32> to vector<128x128xbf16>
    %c1 = arith.constant 1 : index
    %c0_7 = arith.constant 0 : index
    %c0_8 = arith.constant 0 : index
    %19 = vector.load %arg2[%c1, %c0_7, %c0_8] : memref<5x16x128xbf16, #tpu.memory_space<vmem>>, vector<1x16x128xbf16>
    %20 = vector.shape_cast %19 : vector<1x16x128xbf16> to vector<16x128xbf16>
    %cst_9 = arith.constant dense<0.000000e+00> : vector<16x128xf32>
    %21 = tpu.matmul %20, %18, %cst_9 {dimension_numbers = #tpu.dot_dimension_numbers<[1], [0], [0], [1], [0, 0, 1, 1], [], []>} : vector<16x128xbf16>, vector<128x128xbf16>, vector<16x128xf32> -> vector<16x128xf32>
    %22 = arith.addf %12, %21 : vector<16x128xf32>
    %23 = vector.extract_strided_slice %1 {offsets = [2, 0], sizes = [1, 128], strides = [1, 1]} : vector<5x128xi32> to vector<1x128xi32>
    %24 = vector.broadcast %23 : vector<1x128xi32> to vector<128x128xi32>
    %25 = arith.cmpi eq, %24, %3 : vector<128x128xi32>
    %26 = arith.extui %25 : vector<128x128xi1> to vector<128x128xi32>
    %27 = arith.sitofp %26 : vector<128x128xi32> to vector<128x128xf32>
    %28 = arith.truncf %27 : vector<128x128xf32> to vector<128x128xbf16>
    %c2 = arith.constant 2 : index
    %c0_10 = arith.constant 0 : index
    %c0_11 = arith.constant 0 : index
    %29 = vector.load %arg2[%c2, %c0_10, %c0_11] : memref<5x16x128xbf16, #tpu.memory_space<vmem>>, vector<1x16x128xbf16>
    %30 = vector.shape_cast %29 : vector<1x16x128xbf16> to vector<16x128xbf16>
    %cst_12 = arith.constant dense<0.000000e+00> : vector<16x128xf32>
    %31 = tpu.matmul %30, %28, %cst_12 {dimension_numbers = #tpu.dot_dimension_numbers<[1], [0], [0], [1], [0, 0, 1, 1], [], []>} : vector<16x128xbf16>, vector<128x128xbf16>, vector<16x128xf32> -> vector<16x128xf32>
    %32 = arith.addf %22, %31 : vector<16x128xf32>
    %33 = vector.extract_strided_slice %1 {offsets = [3, 0], sizes = [1, 128], strides = [1, 1]} : vector<5x128xi32> to vector<1x128xi32>
    %34 = vector.broadcast %33 : vector<1x128xi32> to vector<128x128xi32>
    %35 = arith.cmpi eq, %34, %3 : vector<128x128xi32>
    %36 = arith.extui %35 : vector<128x128xi1> to vector<128x128xi32>
    %37 = arith.sitofp %36 : vector<128x128xi32> to vector<128x128xf32>
    %38 = arith.truncf %37 : vector<128x128xf32> to vector<128x128xbf16>
    %c3 = arith.constant 3 : index
    %c0_13 = arith.constant 0 : index
    %c0_14 = arith.constant 0 : index
    %39 = vector.load %arg2[%c3, %c0_13, %c0_14] : memref<5x16x128xbf16, #tpu.memory_space<vmem>>, vector<1x16x128xbf16>
    %40 = vector.shape_cast %39 : vector<1x16x128xbf16> to vector<16x128xbf16>
    %cst_15 = arith.constant dense<0.000000e+00> : vector<16x128xf32>
    %41 = tpu.matmul %40, %38, %cst_15 {dimension_numbers = #tpu.dot_dimension_numbers<[1], [0], [0], [1], [0, 0, 1, 1], [], []>} : vector<16x128xbf16>, vector<128x128xbf16>, vector<16x128xf32> -> vector<16x128xf32>
    %42 = arith.addf %32, %41 : vector<16x128xf32>
    %43 = vector.extract_strided_slice %1 {offsets = [4, 0], sizes = [1, 128], strides = [1, 1]} : vector<5x128xi32> to vector<1x128xi32>
    %44 = vector.broadcast %43 : vector<1x128xi32> to vector<128x128xi32>
    %45 = arith.cmpi eq, %44, %3 : vector<128x128xi32>
    %46 = arith.extui %45 : vector<128x128xi1> to vector<128x128xi32>
    %47 = arith.sitofp %46 : vector<128x128xi32> to vector<128x128xf32>
    %48 = arith.truncf %47 : vector<128x128xf32> to vector<128x128xbf16>
    %c4 = arith.constant 4 : index
    %c0_16 = arith.constant 0 : index
    %c0_17 = arith.constant 0 : index
    %49 = vector.load %arg2[%c4, %c0_16, %c0_17] : memref<5x16x128xbf16, #tpu.memory_space<vmem>>, vector<1x16x128xbf16>
    %50 = vector.shape_cast %49 : vector<1x16x128xbf16> to vector<16x128xbf16>
    %cst_18 = arith.constant dense<0.000000e+00> : vector<16x128xf32>
    %51 = tpu.matmul %50, %48, %cst_18 {dimension_numbers = #tpu.dot_dimension_numbers<[1], [0], [0], [1], [0, 0, 1, 1], [], []>} : vector<16x128xbf16>, vector<128x128xbf16>, vector<16x128xf32> -> vector<16x128xf32>
    %52 = arith.addf %42, %51 : vector<16x128xf32>
    %53 = vector.extract_strided_slice %2 {offsets = [0, 0], sizes = [16, 1], strides = [1, 1]} : vector<16x4xf32> to vector<16x1xf32>
    %54 = vector.broadcast %53 : vector<16x1xf32> to vector<16x128xf32>
    %55 = arith.addf %52, %54 : vector<16x128xf32>
    %cst_19 = arith.constant 0.000000e+00 : f32
    %56 = vector.broadcast %cst_19 : f32 to vector<16x128xf32>
    %57 = arith.maximumf %55, %56 : vector<16x128xf32>
    %c0_20 = arith.constant 0 : index
    %c0_21 = arith.constant 0 : index
    %58 = vector.load %arg7[%c0_20, %c0_21] : memref<1x128xf32, #tpu.memory_space<vmem>>, vector<1x128xf32>
    %59 = vector.broadcast %58 : vector<1x128xf32> to vector<16x128xf32>
    %60 = arith.mulf %57, %59 : vector<16x128xf32>
    %c2_22 = arith.constant 2 : index
    %c0_23 = arith.constant 0 : index
    %c0_24 = arith.constant 0 : index
    %61 = vector.load %arg3[%c2_22, %c0_23, %c0_24] : memref<5x16x16xbf16, #tpu.memory_space<vmem>>, vector<1x16x16xbf16>
    %62 = vector.shape_cast %61 : vector<1x16x16xbf16> to vector<16x16xbf16>
    %63 = arith.truncf %60 : vector<16x128xf32> to vector<16x128xbf16>
    %cst_25 = arith.constant dense<0.000000e+00> : vector<16x128xf32>
    %64 = tpu.matmul %62, %63, %cst_25 {dimension_numbers = #tpu.dot_dimension_numbers<[1], [0], [0], [1], [0, 0, 1, 1], [], []>} : vector<16x16xbf16>, vector<16x128xbf16>, vector<16x128xf32> -> vector<16x128xf32>
    %c2_i32 = arith.constant 2 : i32
    %65 = tpu.dynamic_rotate %60 by %c2_i32 dim 1 : vector<16x128xf32>, i32 -> vector<16x128xf32>
    %c0_26 = arith.constant 0 : index
    %c0_27 = arith.constant 0 : index
    %c0_28 = arith.constant 0 : index
    %66 = vector.load %arg3[%c0_26, %c0_27, %c0_28] : memref<5x16x16xbf16, #tpu.memory_space<vmem>>, vector<1x16x16xbf16>
    %67 = vector.shape_cast %66 : vector<1x16x16xbf16> to vector<16x16xbf16>
    %68 = arith.truncf %65 : vector<16x128xf32> to vector<16x128xbf16>
    %cst_29 = arith.constant dense<0.000000e+00> : vector<16x128xf32>
    %69 = tpu.matmul %67, %68, %cst_29 {dimension_numbers = #tpu.dot_dimension_numbers<[1], [0], [0], [1], [0, 0, 1, 1], [], []>} : vector<16x16xbf16>, vector<16x128xbf16>, vector<16x128xf32> -> vector<16x128xf32>
    %70 = arith.addf %64, %69 : vector<16x128xf32>
    %c1_i32 = arith.constant 1 : i32
    %71 = tpu.dynamic_rotate %60 by %c1_i32 dim 1 : vector<16x128xf32>, i32 -> vector<16x128xf32>
    %c1_30 = arith.constant 1 : index
    %c0_31 = arith.constant 0 : index
    %c0_32 = arith.constant 0 : index
    %72 = vector.load %arg3[%c1_30, %c0_31, %c0_32] : memref<5x16x16xbf16, #tpu.memory_space<vmem>>, vector<1x16x16xbf16>
    %73 = vector.shape_cast %72 : vector<1x16x16xbf16> to vector<16x16xbf16>
    %74 = arith.truncf %71 : vector<16x128xf32> to vector<16x128xbf16>
    %cst_33 = arith.constant dense<0.000000e+00> : vector<16x128xf32>
    %75 = tpu.matmul %73, %74, %cst_33 {dimension_numbers = #tpu.dot_dimension_numbers<[1], [0], [0], [1], [0, 0, 1, 1], [], []>} : vector<16x16xbf16>, vector<16x128xbf16>, vector<16x128xf32> -> vector<16x128xf32>
    %76 = arith.addf %70, %75 : vector<16x128xf32>
    %c127_i32 = arith.constant 127 : i32
    %77 = tpu.dynamic_rotate %60 by %c127_i32 dim 1 : vector<16x128xf32>, i32 -> vector<16x128xf32>
    %c3_34 = arith.constant 3 : index
    %c0_35 = arith.constant 0 : index
    %c0_36 = arith.constant 0 : index
    %78 = vector.load %arg3[%c3_34, %c0_35, %c0_36] : memref<5x16x16xbf16, #tpu.memory_space<vmem>>, vector<1x16x16xbf16>
    %79 = vector.shape_cast %78 : vector<1x16x16xbf16> to vector<16x16xbf16>
    %80 = arith.truncf %77 : vector<16x128xf32> to vector<16x128xbf16>
    %cst_37 = arith.constant dense<0.000000e+00> : vector<16x128xf32>
    %81 = tpu.matmul %79, %80, %cst_37 {dimension_numbers = #tpu.dot_dimension_numbers<[1], [0], [0], [1], [0, 0, 1, 1], [], []>} : vector<16x16xbf16>, vector<16x128xbf16>, vector<16x128xf32> -> vector<16x128xf32>
    %82 = arith.addf %76, %81 : vector<16x128xf32>
    %c126_i32 = arith.constant 126 : i32
    %83 = tpu.dynamic_rotate %60 by %c126_i32 dim 1 : vector<16x128xf32>, i32 -> vector<16x128xf32>
    %c4_38 = arith.constant 4 : index
    %c0_39 = arith.constant 0 : index
    %c0_40 = arith.constant 0 : index
    %84 = vector.load %arg3[%c4_38, %c0_39, %c0_40] : memref<5x16x16xbf16, #tpu.memory_space<vmem>>, vector<1x16x16xbf16>
    %85 = vector.shape_cast %84 : vector<1x16x16xbf16> to vector<16x16xbf16>
    %86 = arith.truncf %83 : vector<16x128xf32> to vector<16x128xbf16>
    %cst_41 = arith.constant dense<0.000000e+00> : vector<16x128xf32>
    %87 = tpu.matmul %85, %86, %cst_41 {dimension_numbers = #tpu.dot_dimension_numbers<[1], [0], [0], [1], [0, 0, 1, 1], [], []>} : vector<16x16xbf16>, vector<16x128xbf16>, vector<16x128xf32> -> vector<16x128xf32>
    %88 = arith.addf %82, %87 : vector<16x128xf32>
    %89 = vector.extract_strided_slice %2 {offsets = [0, 1], sizes = [16, 1], strides = [1, 1]} : vector<16x4xf32> to vector<16x1xf32>
    %90 = vector.broadcast %89 : vector<16x1xf32> to vector<16x128xf32>
    %91 = arith.addf %88, %90 : vector<16x128xf32>
    %cst_42 = arith.constant 0.000000e+00 : f32
    %92 = vector.broadcast %cst_42 : f32 to vector<16x128xf32>
    %93 = arith.maximumf %91, %92 : vector<16x128xf32>
    %c0_43 = arith.constant 0 : index
    %c0_44 = arith.constant 0 : index
    %94 = vector.load %arg4[%c0_43, %c0_44] : memref<16x16xbf16, #tpu.memory_space<vmem>>, vector<16x16xbf16>
    %95 = arith.truncf %93 : vector<16x128xf32> to vector<16x128xbf16>
    %cst_45 = arith.constant dense<0.000000e+00> : vector<16x128xf32>
    %96 = tpu.matmul %94, %95, %cst_45 {dimension_numbers = #tpu.dot_dimension_numbers<[1], [0], [0], [1], [0, 0, 1, 1], [], []>} : vector<16x16xbf16>, vector<16x128xbf16>, vector<16x128xf32> -> vector<16x128xf32>
    %97 = vector.extract_strided_slice %2 {offsets = [0, 2], sizes = [16, 1], strides = [1, 1]} : vector<16x4xf32> to vector<16x1xf32>
    %98 = vector.broadcast %97 : vector<16x1xf32> to vector<16x128xf32>
    %99 = arith.addf %96, %98 : vector<16x128xf32>
    %cst_46 = arith.constant 0.000000e+00 : f32
    %100 = vector.broadcast %cst_46 : f32 to vector<16x128xf32>
    %101 = arith.maximumf %99, %100 : vector<16x128xf32>
    %c0_47 = arith.constant 0 : index
    %c0_48 = arith.constant 0 : index
    %102 = vector.load %arg5[%c0_47, %c0_48] : memref<8x16xbf16, #tpu.memory_space<vmem>>, vector<8x16xbf16>
    %103 = arith.truncf %101 : vector<16x128xf32> to vector<16x128xbf16>
    %cst_49 = arith.constant dense<0.000000e+00> : vector<8x128xf32>
    %104 = tpu.matmul %102, %103, %cst_49 {dimension_numbers = #tpu.dot_dimension_numbers<[1], [0], [0], [1], [0, 0, 1, 1], [], []>} : vector<8x16xbf16>, vector<16x128xbf16>, vector<8x128xf32> -> vector<8x128xf32>
    %105 = vector.extract_strided_slice %2 {offsets = [0, 3], sizes = [8, 1], strides = [1, 1]} : vector<16x4xf32> to vector<8x1xf32>
    %106 = vector.broadcast %105 : vector<8x1xf32> to vector<8x128xf32>
    %107 = arith.addf %104, %106 : vector<8x128xf32>
    %c0_50 = arith.constant 0 : index
    %c0_51 = arith.constant 0 : index
    %c0_52 = arith.constant 0 : index
    %108 = vector.load %arg8[%c0_50, %c0_51, %c0_52] : memref<1x8x128xf32, #tpu.memory_space<vmem>>, vector<1x8x128xf32>
    %109 = vector.shape_cast %108 : vector<1x8x128xf32> to vector<8x128xf32>
    %110 = vector.shape_cast %107 : vector<8x128xf32> to vector<1x8x128xf32>
    tpu.vector_store %arg8[%c0_50, %c0_51, %c0_52], %110 {strides = array<i32>} : memref<1x8x128xf32, #tpu.memory_space<vmem>>, vector<1x8x128xf32>,
    return
  }
  func.func @transform_0(%arg0: i32) -> (i32, i32, i32) {
    %c0_i32 = arith.constant 0 : i32
    %c0_i32_0 = arith.constant 0 : i32
    %c0_i32_1 = arith.constant 0 : i32
    return %arg0, %c0_i32, %c0_i32_0 : i32, i32, i32
  }
  func.func @transform_1(%arg0: i32) -> (i32, i32, i32) {
    %c0_i32 = arith.constant 0 : i32
    %c0_i32_0 = arith.constant 0 : i32
    %c0_i32_1 = arith.constant 0 : i32
    %c0_i32_2 = arith.constant 0 : i32
    return %c0_i32, %c0_i32_0, %c0_i32_1 : i32, i32, i32
  }
  func.func @transform_2(%arg0: i32) -> (i32, i32, i32) {
    %c0_i32 = arith.constant 0 : i32
    %c0_i32_0 = arith.constant 0 : i32
    %c0_i32_1 = arith.constant 0 : i32
    %c0_i32_2 = arith.constant 0 : i32
    return %c0_i32, %c0_i32_0, %c0_i32_1 : i32, i32, i32
  }
  func.func @transform_3(%arg0: i32) -> (i32, i32) {
    %c0_i32 = arith.constant 0 : i32
    %c0_i32_0 = arith.constant 0 : i32
    %c0_i32_1 = arith.constant 0 : i32
    return %c0_i32, %c0_i32_0 : i32, i32
  }
  func.func @transform_4(%arg0: i32) -> (i32, i32) {
    %c0_i32 = arith.constant 0 : i32
    %c0_i32_0 = arith.constant 0 : i32
    %c0_i32_1 = arith.constant 0 : i32
    return %c0_i32, %c0_i32_0 : i32, i32
  }
  func.func @transform_5(%arg0: i32) -> (i32, i32) {
    %c0_i32 = arith.constant 0 : i32
    %c0_i32_0 = arith.constant 0 : i32
    %c0_i32_1 = arith.constant 0 : i32
    return %c0_i32, %c0_i32_0 : i32, i32
  }
  func.func @transform_6(%arg0: i32) -> (i32, i32) {
    %c0_i32 = arith.constant 0 : i32
    %c0_i32_0 = arith.constant 0 : i32
    %c0_i32_1 = arith.constant 0 : i32
    return %c0_i32, %c0_i32_0 : i32, i32
  }
  func.func @transform_7(%arg0: i32) -> (i32, i32, i32) {
    %c0_i32 = arith.constant 0 : i32
    %c0_i32_0 = arith.constant 0 : i32
    %c0_i32_1 = arith.constant 0 : i32
    return %arg0, %c0_i32, %c0_i32_0 : i32, i32, i32
  }
}

</mosaic_0001>

<bundles_post_ra>
// kernel: encoder_ssptm_pallas.1
= control target key start
LH: loop header
LB: loop body
LE: loop exit
PB: predicated region body
PF: predicated region fallthrough
CT: control target
= control target key end

     0   :  { %s1858_s24 = smov 0   ;;  %s2474_s0 = inlined_call_operand.vmem [shape: s32[2,5,128], index: 0, kind: input, shape index: {}]   ;;  %s2475_s1 = inlined_call_operand.vmem [shape: bf16[5,16,128], index: 1, kind: input, shape index: {}]   ;;  %s2476_s2 = inlined_call_operand.vmem [shape: bf16[5,16,16], index: 2, kind: input, shape index: {}]   ;;  %s2477_s3 = inlined_call_operand.vmem [shape: bf16[16,16], index: 3, kind: input, shape index: {}]   ;;  %s2478_s4 = inlined_call_operand.vmem [shape: bf16[8,16], index: 4, kind: input, shape index: {}]   ;;  %s2479_s5 = inlined_call_operand.vmem [shape: f32[16,4], index: 5, kind: input, shape index: {}]   ;;  %s2480_s6 = inlined_call_operand.vmem [shape: f32[1,128], index: 6, kind: input, shape index: {}]   ;;  %s2481_s7 = inlined_call_operand.vmem [shape: f32[2,8,128], index: 7, kind: output, shape index: {}]  }
   0x1 LB: > { %s1337_s25 = sadd.s32 4294967295, %s1805_s24   ;;  %p1341_p0 = scmp.ge.s32.totalorder %s1805_s24, 1  ;;  %s1805_s24 = sphi %s1858_s24, %s17_s24  }
   0x2   : > { %p236_p1 = scmp.lt.s32.totalorder %s1805_s24, 3 }
   0x4   : > { %p237_p2 = pnand %p1341_p0, %p236_p1 }
   0x5   : > { %p266_p3 = scmp.lt.s32.totalorder (!%p237_p2), %s1337_s25, 1  ;;  %v278_v0 = vlaneseq (!%p237_p2)  ;;  %v1807_v1 = vmov (!%p237_p2), 0.0   ;;  %vm2482_vm0 = vmmov (!%p237_p2), 0   ;;  %v1809_v13 = vmov (!%p237_p2), 1.0|1.0   ;;  %v1996_v28 = vld [vmem:[%s2479_s5] sm:$0xff] (!%p237_p2) }
   0x6   : > { %240 = sbr.rel (%p237_p2) target bundleno = 1151 (0x47f), region = 48  ;;  %1600 = vmatprep.subr.bf16.mxu0 (!%p237_p2), %v1807_v1  ;;  %1620 = vmatprep.subr.bf16.mxu1 (!%p237_p2), %v1807_v1  ;;  %v1810_v25 = vmov (!%p237_p2), 0   ;;  %v2053_v33 = vld [vmem:[%s2479_s5 + $0x8] sm:$0xff] (!%p237_p2)  ;;  %v1789_v40 = vld [vmem:[%s2475_s1] sm:$0xff] (!%p237_p2)   ;;  %v2519_v48 = vmov (!%p237_p2), 0  ;;  %v2523_v49 = vmov (!%p237_p2), 0 }
   0x7   : > { %v1870_v2 = vshrl.u32 (!%p237_p2), %v278_v0, 7  ;;  %1616 = vmatprep.mubr.msk.bf16.mxu0 (!%p237_p2), %vm2482_vm0, %v1807_v1  ;;  %1636 = vmatprep.mubr.msk.bf16.mxu1 (!%p237_p2), %vm2482_vm0, %v1807_v1  ;;  %v1788_v38 = vld [vmem:[%s2475_s1 + $0x8] sm:$0xff] (!%p237_p2)   ;;  %v2527_v50 = vmov (!%p237_p2), 0  ;;  %v2531_v51 = vmov (!%p237_p2), 0  ;;  %v1790_v52 = vld [vmem:[%s2475_s1 + $0x10] sm:$0xff] (!%p237_p2)   ;;  %v1791_v53 = vld [vmem:[%s2475_s1 + $0x18] sm:$0xff] (!%p237_p2)  }
   0x8   : > { %1761 = vset.pattern.permute.xlu0 (!%p237_p2), %v1810_v25  ;;  %v1792_v54 = vld [vmem:[%s2475_s1 + $0x20] sm:$0xff] (!%p237_p2)   ;;  %s1811_s23 = smov (!%p237_p2), 127   ;;  %s1812_s27 = smov (!%p237_p2), 2   ;;  %v1794_v46 = vld [vmem:[%s2476_s2 + $0x10] sm:$0xff] (!%p237_p2)  }
   0x9   : > { %v359_v3 = vsub.s32 (!%p237_p2), 1, %v1870_v2  ;;  %v297_v4 = vsub.s32 (!%p237_p2), 0, %v1870_v2  ;;  %v1885_v5 = vadd.s32 (!%p237_p2), 8, %v1870_v2  ;;  %v1890_v7 = vadd.s32 (!%p237_p2), 16, %v1870_v2  ;;  %852 = vperm.xlu0 (!%p237_p2), %1761, %v1996_v28   ;;  %v1517_v25 = vld [vmem:[%s2480_s6] ss:$0 sm:$0xff] (!%p237_p2) }
   0xa   : > { %v1893_v8 = vadd.s32 (!%p237_p2), 24, %v1870_v2  ;;  %v1902_v11 = vadd.s32 (!%p237_p2), 32, %v1870_v2  ;;  %v1905_v12 = vadd.s32 (!%p237_p2), 40, %v1870_v2  ;;  %v1932_v14 = vadd.s32 (!%p237_p2), 48, %v1870_v2  ;;  %s1813_s28 = smov (!%p237_p2), 1   ;;  %v1793_v39 = vld [vmem:[%s2476_s2] sm:$0xff] (!%p237_p2)  }
   0xb   : > { %v1935_v15 = vadd.s32 (!%p237_p2), 56, %v1870_v2  ;;  %v740_v16 = vsub.s32 (!%p237_p2), 4, %v1870_v2  ;;  %v1951_v17 = vadd.s32 (!%p237_p2), 64, %v1870_v2  ;;  %v1954_v18 = vadd.s32 (!%p237_p2), 72, %v1870_v2  ;;  %v1796_v47 = vld [vmem:[%s2476_s2 + $0x20] sm:$0xff] (!%p237_p2)  }
   0xc   : > { %v1967_v20 = vadd.s32 (!%p237_p2), 80, %v1870_v2  ;;  %v1975_v21 = vadd.s32 (!%p237_p2), 88, %v1870_v2  ;;  %v1978_v22 = vadd.s32 (!%p237_p2), 96, %v1870_v2  ;;  %v1985_v23 = vadd.s32 (!%p237_p2), 104, %v1870_v2 }
   0xd   : > { %s2538_s25 = smov (!%p266_p3, %s1337_s25), 1  ;;  %v1988_v24 = vadd.s32 112, %v1870_v2  ;;  %v516_v26 = vsub.s32 2, %v1870_v2  ;;  %v628_v27 = vsub.s32 3, %v1870_v2  ;;  %v2009_v29 = vadd.s32 120, %v1870_v2  ;;  %857 = vperm.xlu0 %1761, %v2053_v33  }
   0xe   : > { %s1342_s26 = sshll.u32 %s2538_s25, 3 }
   0xf   : > { %s269_s29 = scalar_lea.vmem %s2474_s0, %s1342_s26 }
  0x10   : > { %v1887_v6 = vld [vmem:[%s269_s29] sm:$0x1f]  ;;  %s1814_s29 = smov 126  }
  0x11   : > { %v1896_v9 = vrot.slane %v1887_v6, %v359_v3  ;;  %v1899_v10 = vrot.slane %v1887_v6, %v297_v4  ;;  %v1961_v19 = vrot.slane %v1887_v6, %v740_v16  ;;  %v2041_v31 = vrot.slane %v1887_v6, %v516_v26 }
  0x12   : > { %v2044_v32 = vrot.slane %v1887_v6, %v628_v27 }
  0x13   : > { %vm361_vm1 = vcmp.eq.s32.totalorder %v1896_v9, %v1870_v2  ;;  %vm362_vm2 = vcmp.eq.s32.totalorder %v1896_v9, %v1885_v5  ;;  %vm299_vm3 = vcmp.eq.s32.totalorder %v1899_v10, %v1870_v2  ;;  %vm300_vm4 = vcmp.eq.s32.totalorder %v1899_v10, %v1885_v5 }
  0x14   : > { %vm1379_vm5 = vmpackc.low %vm362_vm2, %vm361_vm1  ;;  %vm363_vm6 = vcmp.eq.s32.totalorder %v1896_v9, %v1890_v7  ;;  %vm364_vm7 = vcmp.eq.s32.totalorder %v1896_v9, %v1893_v8  ;;  %vm301_vm8 = vcmp.eq.s32.totalorder %v1899_v10, %v1890_v7  ;;  %vm302_vm9 = vcmp.eq.s32.totalorder %v1899_v10, %v1893_v8 }
  0x15   : > { %1601 = vmatpush3.bf16.msk.msra.mxu0 %vm1379_vm5, %v1809_v13  ;;  %vm1396_vm10 = vmpackc.low %vm300_vm4, %vm299_vm3  ;;  %vm365_vm13 = vcmp.eq.s32.totalorder %v1896_v9, %v1902_v11  ;;  %vm366_vm14 = vcmp.eq.s32.totalorder %v1896_v9, %v1905_v12  ;;  %vm303_vm15 = vcmp.eq.s32.totalorder %v1899_v10, %v1902_v11  ;;  %vm304_vm1 = vcmp.eq.s32.totalorder %v1899_v10, %v1905_v12 }
  0x16   : > { %1621 = vmatpush3.bf16.msk.msra.mxu1 %vm1396_vm10, %v1809_v13  ;;  %1602 = vmatprep.subr.bf16.mxu0 %v1807_v1  ;;  %vm1381_vm11 = vmpackc.low %vm364_vm7, %vm363_vm6  ;;  %vm367_vm4 = vcmp.eq.s32.totalorder %v1896_v9, %v1932_v14  ;;  %vm368_vm5 = vcmp.eq.s32.totalorder %v1896_v9, %v1935_v15  ;;  %vm305_vm6 = vcmp.eq.s32.totalorder %v1899_v10, %v1932_v14 }
  0x17   : > { %1622 = vmatprep.subr.bf16.mxu1 %v1807_v1  ;;  %vm1398_vm12 = vmpackc.low %vm302_vm9, %vm301_vm8  ;;  %vm306_vm7 = vcmp.eq.s32.totalorder %v1899_v10, %v1935_v15  ;;  %vm369_vm10 = vcmp.eq.s32.totalorder %v1896_v9, %v1951_v17  ;;  %vm313_vm0 = vcmp.eq.s32.totalorder %v1899_v10, %v1988_v24 }
  0x18   : > { %vm1383_vm2 = vmpackc.low %vm366_vm14, %vm365_vm13  ;;  %vm308_vm13 = vcmp.eq.s32.totalorder %v1899_v10, %v1954_v18 }
  0x19   : > { %1603 = vmatpush3.bf16.msk.msra.mxu0 %vm1381_vm11, %v1809_v13  ;;  %vm1400_vm3 = vmpackc.low %vm304_vm1, %vm303_vm15  ;;  %vm370_vm11 = vcmp.eq.s32.totalorder %v1896_v9, %v1954_v18  ;;  %vm371_vm15 = vcmp.eq.s32.totalorder %v1896_v9, %v1967_v20 }
  0x1a   : > { %1623 = vmatpush3.bf16.msk.msra.mxu1 %vm1398_vm12, %v1809_v13  ;;  %1604 = vmatprep.subr.bf16.mxu0 %v1807_v1  ;;  %vm1385_vm8 = vmpackc.low %vm368_vm5, %vm367_vm4  ;;  %vm307_vm12 = vcmp.eq.s32.totalorder %v1899_v10, %v1951_v17  ;;  %vm310_vm4 = vcmp.eq.s32.totalorder %v1899_v10, %v1975_v21  ;;  %vm373_vm5 = vcmp.eq.s32.totalorder %v1896_v9, %v1978_v22 }
  0x1b   : > { %1624 = vmatprep.subr.bf16.mxu1 %v1807_v1  ;;  %vm1402_vm9 = vmpackc.low %vm306_vm7, %vm305_vm6  ;;  %vm374_vm6 = vcmp.eq.s32.totalorder %v1896_v9, %v1985_v23  ;;  %vm311_vm7 = vcmp.eq.s32.totalorder %v1899_v10, %v1978_v22 }
  0x1c   : > { %vm1387_vm14 = vmpackc.low %vm370_vm11, %vm369_vm10  ;;  %vm742_vm10 = vcmp.eq.s32.totalorder %v1961_v19, %v1870_v2  ;;  %vm518_vm11 = vcmp.eq.s32.totalorder %v2041_v31, %v1870_v2 }
  0x1d   : > { %1605 = vmatpush3.bf16.msk.msra.mxu0 %vm1383_vm2, %v1809_v13  ;;  %vm2018_vm1 = vmpackc.low %vm308_vm13, %vm307_vm12  ;;  %vm372_vm2 = vcmp.eq.s32.totalorder %v1896_v9, %v1975_v21  ;;  %vm314_vm13 = vcmp.eq.s32.totalorder %v1899_v10, %v2009_v29 }
  0x1e   : > { %1625 = vmatpush3.bf16.msk.msra.mxu1 %vm1400_vm3, %v1809_v13  ;;  %1606 = vmatprep.subr.bf16.mxu0 %v1807_v1  ;;  %vm309_vm3 = vcmp.eq.s32.totalorder %v1899_v10, %v1967_v20  ;;  %vm1389_vm12 = vmpackc.low %vm372_vm2, %vm371_vm15  ;;  %vm747_vm15 = vcmp.eq.s32.totalorder %v1961_v19, %v1905_v12 }
  0x1f   : > { %1626 = vmatprep.subr.bf16.mxu1 %v1807_v1 }
  0x21   : > { %1607 = vmatpush3.bf16.msk.msra.mxu0 %vm1385_vm8, %v1809_v13  ;;  %vm312_vm8 = vcmp.eq.s32.totalorder %v1899_v10, %v1985_v23 }
  0x22   : > { %1627 = vmatpush3.bf16.msk.msra.mxu1 %vm1402_vm9, %v1809_v13  ;;  %1608 = vmatprep.subr.bf16.mxu0 %v1807_v1  ;;  %vm375_vm9 = vcmp.eq.s32.totalorder %v1896_v9, %v1988_v24 }
  0x23   : > { %1628 = vmatprep.subr.bf16.mxu1 %v1807_v1 }
  0x25   : > { %1609 = vmatpush3.bf16.msk.msra.mxu0 %vm1387_vm14, %v1809_v13  ;;  %vm376_vm14 = vcmp.eq.s32.totalorder %v1896_v9, %v2009_v29 }
  0x26   : > { %1629 = vmatpush3.bf16.msk.msra.mxu1 %vm2018_vm1, %v1809_v13  ;;  %1610 = vmatprep.subr.bf16.mxu0 %v1807_v1  ;;  %vm1406_vm1 = vmpackc.low %vm310_vm4, %vm309_vm3  ;;  %vm630_vm4 = vcmp.eq.s32.totalorder %v2044_v32, %v1870_v2  ;;  %vm631_vm3 = vcmp.eq.s32.totalorder %v2044_v32, %v1885_v5 }
  0x27   : > { %1630 = vmatprep.subr.bf16.mxu1 %v1807_v1 }
  0x29   : > { %1611 = vmatpush3.bf16.msk.msra.mxu0 %vm1389_vm12, %v1809_v13  ;;  %vm1391_vm12 = vmpackc.low %vm374_vm6, %vm373_vm5  ;;  %vm519_vm5 = vcmp.eq.s32.totalorder %v2041_v31, %v1885_v5 }
  0x2a   : > { %1631 = vmatpush3.bf16.msk.msra.mxu1 %vm1406_vm1, %v1809_v13  ;;  %1612 = vmatprep.subr.bf16.mxu0 %v1807_v1  ;;  %vm1408_vm1 = vmpackc.low %vm312_vm8, %vm311_vm7  ;;  %vm520_vm8 = vcmp.eq.s32.totalorder %v2041_v31, %v1890_v7 }
  0x2b   : > { %1632 = vmatprep.subr.bf16.mxu1 %v1807_v1  ;;  %vm2130_vm6 = vmpackc.low %vm376_vm14, %vm375_vm9  ;;  %vm521_vm9 = vcmp.eq.s32.totalorder %v2041_v31, %v1893_v8 }
  0x2c   : > { %vm2139_vm7 = vmpackc.low %vm314_vm13, %vm313_vm0  ;;  %vm632_vm0 = vcmp.eq.s32.totalorder %v2044_v32, %v1890_v7  ;;  %vm633_vm13 = vcmp.eq.s32.totalorder %v2044_v32, %v1893_v8 }
  0x2d   : > { %1613 = vmatpush3.bf16.msk.msra.mxu0 %vm1391_vm12, %v1809_v13  ;;  %vm2149_vm14 = vmpackc.low %vm519_vm5, %vm518_vm11  ;;  %vm523_vm11 = vcmp.eq.s32.totalorder %v2041_v31, %v1905_v12 }
  0x2e   : > { %1633 = vmatpush3.bf16.msk.msra.mxu1 %vm1408_vm1, %v1809_v13  ;;  %1614 = vmatprep.subr.bf16.mxu0 %v1807_v1  ;;  %vm2158_vm12 = vmpackc.low %vm631_vm3, %vm630_vm4  ;;  %vm522_vm1 = vcmp.eq.s32.totalorder %v2041_v31, %v1902_v11  ;;  %vm634_vm3 = vcmp.eq.s32.totalorder %v2044_v32, %v1902_v11  ;;  %vm635_vm4 = vcmp.eq.s32.totalorder %v2044_v32, %v1905_v12 }
  0x2f   : > { %1634 = vmatprep.subr.bf16.mxu1 %v1807_v1  ;;  %vm2169_vm5 = vmpackc.low %vm521_vm9, %vm520_vm8  ;;  %vm2502_vm9 = vcmp.eq.s32.totalorder %v1961_v19, %v1885_v5 }
  0x30   : > { %vm2183_vm2 = vmpackc.low %vm633_vm13, %vm632_vm0  ;;  %vm2505_vm0 = vcmp.eq.s32.totalorder %v1961_v19, %v1890_v7  ;;  %vm2506_vm13 = vcmp.eq.s32.totalorder %v1961_v19, %v1893_v8 }
  0x31   : > { %1615 = vmatpush3.bf16.msk.msra.mxu0 %vm2130_vm6, %v1809_v13  ;;  %vm2191_vm8 = vmpackc.low %vm523_vm11, %vm522_vm1  ;;  %vm2512_vm11 = vmmov 0  }
  0x32   : > { %1635 = vmatpush3.bf16.msk.msra.mxu1 %vm2139_vm7, %v1809_v13  ;;  %1640 = vmatprep.subr.bf16.mxu0 %v1807_v1  ;;  %vm2196_vm6 = vmpackc.low %vm635_vm4, %vm634_vm3  ;;  %vm2514_vm3 = vcmp.eq.s32.totalorder %v1961_v19, %v1935_v15 }
  0x33   : > { %1660 = vmatprep.subr.bf16.mxu1 %v1807_v1  ;;  %vm2206_vm7 = vmpackc.low %vm2502_vm9, %vm742_vm10  ;;  %vm2509_vm10 = vcmp.eq.s32.totalorder %v1961_v19, %v1902_v11  ;;  %vm2518_vm9 = vcmp.eq.s32.totalorder %v1961_v19, %v1954_v18 }
  0x34   : > { %1617 = vmatmul.mubr.bf16.vlgmr.msra.gmra.mrb[0].mxu0 %v1788_v38  ;;  %vm2219_vm1 = vmpackc.low %vm2506_vm13, %vm2505_vm0  ;;  %vm2521_vm13 = vcmp.eq.s32.totalorder %v1961_v19, %v1967_v20 }
  0x35   : > { %1637 = vmatmul.mubr.bf16.vlgmr.msra.gmra.mrb[0].mxu1 %v1789_v40  ;;  %1641 = vmatpush3.bf16.msk.msra.mxu0 %vm2149_vm14, %v1809_v13  ;;  %vm2233_vm14 = vmpackc.low %vm747_vm15, %vm2509_vm10  ;;  %vm2517_vm15 = vcmp.eq.s32.totalorder %v1961_v19, %v1951_v17  ;;  %vm2522_vm10 = vcmp.eq.s32.totalorder %v1961_v19, %v1975_v21 }
  0x36   : > { %1661 = vmatpush3.bf16.msk.msra.mxu1 %vm2158_vm12, %v1809_v13  ;;  %1642 = vmatprep.subr.bf16.mxu0 %v1807_v1  ;;  %vm2513_vm12 = vcmp.eq.s32.totalorder %v1961_v19, %v1932_v14  ;;  %vm2258_vm0 = vmpackc.low %vm2518_vm9, %vm2517_vm15  ;;  %vm524_vm9 = vcmp.eq.s32.totalorder %v2041_v31, %v1932_v14 }
  0x37   : > { %1662 = vmatprep.subr.bf16.mxu1 %v1807_v1  ;;  %1656 = vmatprep.mubr.msk.bf16.mxu0 %vm2512_vm11, %v1807_v1  ;;  %vm2246_vm4 = vmpackc.low %vm2514_vm3, %vm2513_vm12  ;;  %v2520_v48 = vsel %vm2258_vm0, 4294967295, %v2519_v48  ;;  %vm2525_vm3 = vcmp.eq.s32.totalorder %v1961_v19, %v1978_v22  ;;  %vm638_vm0 = vcmp.eq.s32.totalorder %v2044_v32, %v1951_v17 }
  0x38   : > { %1676 = vmatprep.mubr.msk.bf16.mxu1 %vm2512_vm11, %v1807_v1  ;;  %vm2271_vm12 = vmpackc.low %vm2522_vm10, %vm2521_vm13  ;;  %vm2529_vm13 = vcmp.eq.s32.totalorder %v1961_v19, %v1988_v24  ;;  %vm2530_vm10 = vcmp.eq.s32.totalorder %v1961_v19, %v2009_v29 }
  0x39   : > { %1643 = vmatpush3.bf16.msk.msra.mxu0 %vm2169_vm5, %v1809_v13  ;;  %v2524_v49 = vsel %vm2271_vm12, 4294967295, %v2523_v49  ;;  %vm2526_vm5 = vcmp.eq.s32.totalorder %v1961_v19, %v1985_v23  ;;  %vm2300_vm12 = vmpackc.low %vm2530_vm10, %vm2529_vm13 }
  0x3a   : > { %1663 = vmatpush3.bf16.msk.msra.mxu1 %vm2183_vm2, %v1809_v13  ;;  %1644 = vmatprep.subr.bf16.mxu0 %v1807_v1  ;;  %vm2285_vm15 = vmpackc.low %vm2526_vm5, %vm2525_vm3  ;;  %vm525_vm2 = vcmp.eq.s32.totalorder %v2041_v31, %v1935_v15  ;;  %v2532_v51 = vsel %vm2300_vm12, 4294967295, %v2531_v51  ;;  %vm636_vm3 = vcmp.eq.s32.totalorder %v2044_v32, %v1932_v14  ;;  %vm637_vm5 = vcmp.eq.s32.totalorder %v2044_v32, %v1935_v15 }
  0x3b   : > { %v2528_v50 = vsel %vm2285_vm15, 4294967295, %v2527_v50  ;;  %1664 = vmatprep.subr.bf16.mxu1 %v1807_v1  ;;  %vm1437_vm13 = vmpackc.low %vm525_vm2, %vm524_vm9  ;;  %vm526_vm12 = vcmp.eq.s32.totalorder %v2041_v31, %v1951_v17  ;;  %vm527_vm15 = vcmp.eq.s32.totalorder %v2041_v31, %v1954_v18  ;;  %vm528_vm2 = vcmp.eq.s32.totalorder %v2041_v31, %v1967_v20 }
  0x3c   : > { %vm1472_vm10 = vmpackc.low %vm637_vm5, %vm636_vm3  ;;  %vm529_vm3 = vcmp.eq.s32.totalorder %v2041_v31, %v1975_v21  ;;  %vm640_vm5 = vcmp.eq.s32.totalorder %v2044_v32, %v1967_v20 }
  0x3d   : > { %1645 = vmatpush3.bf16.msk.msra.mxu0 %vm2191_vm8, %v1809_v13  ;;  %vm639_vm8 = vcmp.eq.s32.totalorder %v2044_v32, %v1954_v18 }
  0x3e   : > { %1665 = vmatpush3.bf16.msk.msra.mxu1 %vm2196_vm6, %v1809_v13  ;;  %1646 = vmatprep.subr.bf16.mxu0 %v1807_v1  ;;  %vm1439_vm6 = vmpackc.low %vm527_vm15, %vm526_vm12  ;;  %vm530_vm15 = vcmp.eq.s32.totalorder %v2041_v31, %v1978_v22 }
  0x3f   : > { %1666 = vmatprep.subr.bf16.mxu1 %v1807_v1  ;;  %vm1474_vm9 = vmpackc.low %vm639_vm8, %vm638_vm0  ;;  %vm642_vm8 = vcmp.eq.s32.totalorder %v2044_v32, %v1978_v22 }
  0x40   : > { %vm1441_vm12 = vmpackc.low %vm529_vm3, %vm528_vm2  ;;  %vm532_vm3 = vcmp.eq.s32.totalorder %v2041_v31, %v1988_v24 }
  0x41   : > { %1647 = vmatpush3.bf16.msk.msra.mxu0 %vm1437_vm13, %v1809_v13  ;;  %vm641_vm13 = vcmp.eq.s32.totalorder %v2044_v32, %v1975_v21 }
  0x42   : > { %1667 = vmatpush3.bf16.msk.msra.mxu1 %vm1472_vm10, %v1809_v13  ;;  %1648 = vmatprep.subr.bf16.mxu0 %v1807_v1  ;;  %vm1476_vm0 = vmpackc.low %vm641_vm13, %vm640_vm5  ;;  %vm531_vm10 = vcmp.eq.s32.totalorder %v2041_v31, %v1985_v23  ;;  %vm533_vm5 = vcmp.eq.s32.totalorder %v2041_v31, %v2009_v29  ;;  %vm644_vm13 = vcmp.eq.s32.totalorder %v2044_v32, %v1988_v24 }
  0x43   : > { %1668 = vmatprep.subr.bf16.mxu1 %v1807_v1 }
  0x45   : > { %1649 = vmatpush3.bf16.msk.msra.mxu0 %vm1439_vm6, %v1809_v13  ;;  %vm643_vm6 = vcmp.eq.s32.totalorder %v2044_v32, %v1985_v23 }
  0x46   : > { %1669 = vmatpush3.bf16.msk.msra.mxu1 %vm1474_vm9, %v1809_v13  ;;  %1650 = vmatprep.subr.bf16.mxu0 %v1807_v1  ;;  %vm1443_vm9 = vmpackc.low %vm531_vm10, %vm530_vm15  ;;  %vm889_vm10 = vcmask 130048  }
  0x47   : > { %1670 = vmatprep.subr.bf16.mxu1 %v1807_v1  ;;  %vm1478_vm2 = vmpackc.low %vm643_vm6, %vm642_vm8 }
  0x49   : > { %1651 = vmatpush3.bf16.msk.msra.mxu0 %vm1441_vm12, %v1809_v13  ;;  %vm645_vm12 = vcmp.eq.s32.totalorder %v2044_v32, %v2009_v29  ;;  %v1815_v32 = vmov 1  }
  0x4a   : > { %1671 = vmatpush3.bf16.msk.msra.mxu1 %vm1476_vm0, %v1809_v13  ;;  %1652 = vmatprep.subr.bf16.mxu0 %v1807_v1  ;;  %vm1445_vm0 = vmpackc.low %vm533_vm5, %vm532_vm3 }
  0x4b   : > { %1672 = vmatprep.subr.bf16.mxu1 %v1807_v1  ;;  %vm1480_vm15 = vmpackc.low %vm645_vm12, %vm644_vm13  ;;  %1782 = vset.pattern.permute.xlu0 %v1815_v32 }
  0x4c   : > { %1783 = vset.pattern.permute.xlu1 %v1815_v32 }
  0x4d   : > { %1653 = vmatpush3.bf16.msk.msra.mxu0 %vm1443_vm9, %v1809_v13 }
  0x4e   : > { %1673 = vmatpush3.bf16.msk.msra.mxu1 %vm1478_vm2, %v1809_v13  ;;  %1654 = vmatprep.subr.bf16.mxu0 %v1807_v1 }
  0x4f   : > { %1674 = vmatprep.subr.bf16.mxu1 %v1807_v1 }
  0x51   : > { %1655 = vmatpush3.bf16.msk.msra.mxu0 %vm1445_vm0, %v1809_v13 }
  0x52   : > { %1675 = vmatpush3.bf16.msk.msra.mxu1 %vm1480_vm15, %v1809_v13  ;;  %1680 = vmatprep.subr.bf16.mxu0 %v1807_v1 }
  0x53   : > { %1700 = vmatprep.subr.bf16.mxu1 %v1807_v1 }
  0x54   : > { %1657 = vmatmul.mubr.bf16.vlgmr.msra.gmra.mrb[4].mxu0 %v1790_v52  ;;  %v1795_v52 = vld [vmem:[%s2476_s2 + $0x8] sm:$0xff]  }
  0x55   : > { %1681 = vmatpush3.bf16.msk.msra.mxu0 %vm2206_vm7, %v1809_v13  ;;  %1677 = vmatmul.mubr.bf16.vlgmr.msra.gmra.mrb[4].mxu1 %v1791_v53  ;;  %vm2533_vm7 = vnez %v2520_v48 }
  0x56   : > { %1682 = vmatprep.subr.bf16.mxu0 %v1807_v1  ;;  %1696 = vmatprep.mubr.msk.bf16.mxu0 %vm2512_vm11, %v1807_v1 }
  0x57   : > { %1702 = vmatprep.mubr.msk.bf16.mxu1 %vm2512_vm11, %v1807_v1 }
  0x59   : > { %1683 = vmatpush3.bf16.msk.msra.mxu0 %vm2219_vm1, %v1809_v13  ;;  %vm2534_vm1 = vnez %v2524_v49 }
  0x5a   : > { %1684 = vmatprep.subr.bf16.mxu0 %v1807_v1 }
  0x5d   : > { %1685 = vmatpush3.bf16.msk.msra.mxu0 %vm2233_vm14, %v1809_v13  ;;  %vm2535_vm14 = vnez %v2528_v50 }
  0x5e   : > { %1686 = vmatprep.subr.bf16.mxu0 %v1807_v1 }
  0x61   : > { %1687 = vmatpush3.bf16.msk.msra.mxu0 %vm2246_vm4, %v1809_v13  ;;  %vm2536_vm4 = vnez %v2532_v51 }
  0x62   : > { %1688 = vmatprep.subr.bf16.mxu0 %v1807_v1 }
  0x65   : > { %1689 = vmatpush3.bf16.msk.msra.mxu0 %vm2533_vm7, %v1809_v13 }
  0x66   : > { %1690 = vmatprep.subr.bf16.mxu0 %v1807_v1 }
  0x69   : > { %1691 = vmatpush3.bf16.msk.msra.mxu0 %vm2534_vm1, %v1809_v13 }
  0x6a   : > { %1692 = vmatprep.subr.bf16.mxu0 %v1807_v1 }
  0x6d   : > { %1693 = vmatpush3.bf16.msk.msra.mxu0 %vm2535_vm14, %v1809_v13 }
  0x6e   : > { %1694 = vmatprep.subr.bf16.mxu0 %v1807_v1 }
  0x71   : > { %1695 = vmatpush3.bf16.msk.msra.mxu0 %vm2536_vm4, %v1809_v13 }
  0x72   : > { %1724 = vmatprep.subr.bf16.mxu0 %v1807_v1 }
  0x74   : > { %1697 = vmatmul.mubr.bf16.vlgmr.msra.gmra.mrb[8].mxu0 %v1792_v54  ;;  %v1797_v54 = vld [vmem:[%s2476_s2 + $0x18] sm:$0xff]  }
  0x75   : > { %1726 = vmatprep.mubr.msk.bf16.mxu0 %vm2512_vm11, %v1807_v1 }
  0x88   : > { %v853_v14 = vpop.permute.xlu0 %852 }
  0x8c   : > { %v858_v22 = vpop.permute.xlu0 %857 }
 0x107   : > { %v460_v55 = vpop.f32.mrb[0].mxu0 }
 0x108   : > { %v507_v56 = vpop.f32.mrb[0].mxu1  ;;  %v1618_v57 = vpop.f32.mrb[1].mxu0 }
 0x109   : > { %v508_v58 = vadd.f32 %v507_v56, %v460_v55  ;;  %v1638_v59 = vpop.f32.mrb[1].mxu1  ;;  %v463_v60 = vpop.f32.mrb[2].mxu0  ;;  %v1816_v55 = vmov 2  }
 0x10a   : > { %v510_v61 = vpop.f32.mrb[2].mxu1  ;;  %v1619_v62 = vpop.f32.mrb[3].mxu0 }
 0x10b   : > { %v511_v63 = vadd.f32 %v510_v61, %v463_v60  ;;  %v1639_v0 = vpop.f32.mrb[3].mxu1 }
 0x127   : > { %v617_v2 = vpop.f32.mrb[4].mxu0 }
 0x128   : > { %v624_v3 = vadd.f32 %v617_v2, %v508_v58  ;;  %v1658_v4 = vpop.f32.mrb[5].mxu0  ;;  %v729_v5 = vpop.f32.mrb[4].mxu1 }
 0x129   : > { %v620_v6 = vpop.f32.mrb[6].mxu0  ;;  %v1678_v7 = vpop.f32.mrb[5].mxu1 }
 0x12a   : > { %v625_v8 = vadd.f32 %v620_v6, %v511_v63  ;;  %v736_v9 = vadd.f32 %v729_v5, %v624_v3  ;;  %v1659_v10 = vpop.f32.mrb[7].mxu0  ;;  %v732_v11 = vpop.f32.mrb[6].mxu1 }
 0x12b   : > { %v1679_v12 = vpop.f32.mrb[7].mxu1 }
 0x12c   : > { %v737_v13 = vadd.f32 %v732_v11, %v625_v8 }
 0x147   : > { %v841_v15 = vpop.f32.mrb[8].mxu0 }
 0x148   : > { %v848_v16 = vadd.f32 %v841_v15, %v736_v9  ;;  %v1698_v17 = vpop.f32.mrb[9].mxu0 }
 0x149   : > { %v844_v18 = vpop.f32.mrb[10].mxu0 }
 0x14a   : > { %v860_v19 = vadd.f32 %v853_v14, %v848_v16  ;;  %v849_v20 = vadd.f32 %v844_v18, %v737_v13  ;;  %v1699_v21 = vpop.f32.mrb[11].mxu0 }
 0x14c   : > { %v862_v23 = vmax.f32 %v860_v19, 0.0  ;;  %v861_v24 = vadd.f32 %v858_v22, %v849_v20 }
 0x14e   : > { %v863_v26 = vmax.f32 %v861_v24, 0.0  ;;  %v871_v27 = vmul.f32 %v1517_v25, %v862_v23 }
 0x150   : > { %v872_v29 = vmul.f32 %v1517_v25, %v863_v26  ;;  %v1798_v26 = vld [vmem:[%s2477_s3] sm:$0xff]  }
 0x152   : > { %v1772_v30 = vpack.i.bf16 %v872_v29, %v871_v27  ;;  %v876_v31 = vpack.c.bf16 %v872_v29, %v871_v27  ;;  %v1817_v27 = vmov 3  }
 0x154   : > { %1773 = vrot.lane.b32.xlu0 %v1772_v30, %s1811_s23  ;;  %1763 = vrot.lane.b32.xlu1 %v1772_v30, %s1812_s27  ;;  %s273_s23 = scalar_lea.vmem %s2481_s7, %s1342_s26 }
 0x158   : > { %1768 = vrot.lane.b32.xlu1 %v1772_v30, %s1813_s28  ;;  %1161 = vperm.xlu0 %1782, %v1996_v28  }
 0x15c   : > { %1778 = vrot.lane.b32.xlu1 %v1772_v30, %s1814_s29  ;;  %1785 = vset.pattern.permute.xlu0 %v1816_v55 }
 0x15d   : > { %1180 = vperm.xlu0 %1785, %v2053_v33  }
 0x160   : > { %1165 = vperm.xlu1 %1783, %v2053_v33  }
 0x161   : > { %1787 = vset.pattern.permute.xlu0 %v1817_v27 }
 0x164   : > { %1784 = vset.pattern.permute.xlu1 %v1816_v55 }
 0x165   : > { %1176 = vperm.xlu1 %1784, %v1996_v28  }
 0x169   : > { %1786 = vset.pattern.permute.xlu1 %v1817_v27 }
 0x16a   : > { %1237 = vperm.xlu1 %1786, %v1996_v28  }
 0x1c6   : > { %v1764_v34 = vpop.permute.xlu1 %1763  ;;  %v1774_v49 = vpop.permute.xlu0 %1773 }
 0x1c7   : > { %v1766_v35 = vunpack.i.h.bf16 %v1764_v34  ;;  %v1765_v36 = vunpack.i.l.bf16 %v1764_v34  ;;  %v1776_v50 = vunpack.i.h.bf16 %v1774_v49  ;;  %v1775_v51 = vunpack.i.l.bf16 %v1774_v49 }
 0x1c9   : > { %v883_v37 = vpack.c.bf16 %v1766_v35, %v1765_v36  ;;  %v1049_v53 = vpack.c.bf16 %v1776_v50, %v1775_v51 }
 0x1ca   : > { %v1769_v38 = vpop.permute.xlu1 %1768 }
 0x1cb   : > { %1701 = vmatpush3.bf16.msra.mxu1 %v883_v37  ;;  %v1771_v43 = vunpack.i.h.bf16 %v1769_v38  ;;  %v1770_v44 = vunpack.i.l.bf16 %v1769_v38 }
 0x1cc   : > { %1706 = vmatprep.subr.bf16.mxu1 %v1807_v1 }
 0x1cd   : > { %v990_v48 = vpack.c.bf16 %v1771_v43, %v1770_v44 }
 0x1ce   : > { %v1779_v40 = vpop.permute.xlu1 %1778  ;;  %1703 = vmatmul.mubr.msk.bf16.vlgmr.msra.gmra.mrb[8].mxu1 %vm889_vm10, %v1793_v39 }
 0x1cf   : > { %v1781_v41 = vunpack.i.h.bf16 %v1779_v40  ;;  %v1780_v42 = vunpack.i.l.bf16 %v1779_v40  ;;  %1707 = vmatpush3.bf16.msra.mxu1 %v876_v31  ;;  %1708 = vmatprep.mubr.msk.bf16.mxu1 %vm2512_vm11, %v1807_v1 }
 0x1d0   : > { %1712 = vmatprep.subr.bf16.mxu1 %v1807_v1 }
 0x1d1   : > { %v1108_v45 = vpack.c.bf16 %v1781_v41, %v1780_v42  ;;  %v1234_v41 = vld [vmem:[%s2478_s4] sm:$0xf] }
 0x1d3   : > { %1725 = vmatpush3.bf16.msra.mxu0 %v1108_v45 }
 0x1d4   : > { %1736 = vmatprep.subr.bf16.mxu0 %v1807_v1 }
 0x1d6   : > { %1709 = vmatmul.mubr.msk.bf16.vlgmr.msra.gmra.mrb[12].mxu1 %vm889_vm10, %v1794_v46  ;;  %1727 = vmatmul.mubr.msk.bf16.vlgmr.msra.gmra.mrb[12].mxu0 %vm889_vm10, %v1796_v47 }
 0x1d7   : > { %1713 = vmatpush3.bf16.msra.mxu1 %v990_v48  ;;  %1714 = vmatprep.mubr.msk.bf16.mxu1 %vm2512_vm11, %v1807_v1  ;;  %v1162_v15 = vpop.permute.xlu0 %1161 }
 0x1d8   : > { %1718 = vmatprep.subr.bf16.mxu1 %v1807_v1  ;;  %1738 = vmatprep.mubr.msk.bf16.mxu0 %vm2512_vm11, %v1807_v1 }
 0x1dc   : > { %v1181_v31 = vpop.permute.xlu0 %1180 }
 0x1de   : > { %1715 = vmatmul.mubr.msk.bf16.vlgmr.msra.gmra.mrb[16].mxu1 %vm889_vm10, %v1795_v52 }
 0x1df   : > { %1719 = vmatpush3.bf16.msra.mxu1 %v1049_v53  ;;  %1720 = vmatprep.mubr.msk.bf16.mxu1 %vm2512_vm11, %v1807_v1  ;;  %v1166_v19 = vpop.permute.xlu1 %1165 }
 0x1e0   : > { %1730 = vmatprep.subr.bf16.mxu1 %v1807_v1 }
 0x1e4   : > { %v1177_v29 = vpop.permute.xlu1 %1176 }
 0x1e6   : > { %1721 = vmatmul.mubr.msk.bf16.vlgmr.msra.gmra.mrb[20].mxu1 %vm889_vm10, %v1797_v54 }
 0x1e7   : > { %1732 = vmatprep.mubr.msk.bf16.mxu1 %vm2512_vm11, %v1807_v1 }
 0x1e9   : > { %v1238_v28 = vpop.permute.xlu1 %1237 }
 0x2a1   : > { %v927_v56 = vpop.f32.mrb[8].mxu1 }
 0x2a2   : > { %v1704_v57 = vpop.f32.mrb[9].mxu1 }
 0x2a3   : > { %v930_v58 = vpop.f32.mrb[10].mxu1 }
 0x2a4   : > { %v1705_v59 = vpop.f32.mrb[11].mxu1 }
 0x2a9   : > { %v976_v60 = vpop.f32.mrb[12].mxu1  ;;  %v1151_v61 = vpop.f32.mrb[12].mxu0 }
 0x2aa   : > { %v977_v62 = vadd.f32 %v976_v60, %v927_v56  ;;  %v1710_v63 = vpop.f32.mrb[13].mxu1  ;;  %v1728_v0 = vpop.f32.mrb[13].mxu0 }
 0x2ab   : > { %v979_v2 = vpop.f32.mrb[14].mxu1  ;;  %v1154_v3 = vpop.f32.mrb[14].mxu0 }
 0x2ac   : > { %v980_v4 = vadd.f32 %v979_v2, %v930_v58  ;;  %v1711_v1 = vpop.f32.mrb[15].mxu1  ;;  %v1729_v5 = vpop.f32.mrb[15].mxu0 }
 0x2b1   : > { %v1033_v6 = vpop.f32.mrb[16].mxu1 }
 0x2b2   : > { %v1040_v7 = vadd.f32 %v1033_v6, %v977_v62  ;;  %v1716_v8 = vpop.f32.mrb[17].mxu1 }
 0x2b3   : > { %v1036_v9 = vpop.f32.mrb[18].mxu1 }
 0x2b4   : > { %v1041_v10 = vadd.f32 %v1036_v9, %v980_v4  ;;  %v1717_v33 = vpop.f32.mrb[19].mxu1 }
 0x2b9   : > { %v1092_v11 = vpop.f32.mrb[20].mxu1 }
 0x2ba   : > { %v1099_v12 = vadd.f32 %v1092_v11, %v1040_v7  ;;  %v1722_v13 = vpop.f32.mrb[21].mxu1 }
 0x2bb   : > { %v1095_v14 = vpop.f32.mrb[22].mxu1 }
 0x2bc   : > { %v1100_v16 = vadd.f32 %v1095_v14, %v1041_v10  ;;  %v1723_v17 = vpop.f32.mrb[23].mxu1  ;;  %v1158_v18 = vadd.f32 %v1151_v61, %v1099_v12 }
 0x2be   : > { %v1168_v20 = vadd.f32 %v1162_v15, %v1158_v18  ;;  %v1159_v21 = vadd.f32 %v1154_v3, %v1100_v16 }
 0x2c0   : > { %v1169_v22 = vadd.f32 %v1166_v19, %v1159_v21  ;;  %v1170_v23 = vmax.f32 %v1168_v20, 0.0 }
 0x2c2   : > { %v1171_v24 = vmax.f32 %v1169_v22, 0.0 }
 0x2c4   : > { %v1174_v25 = vpack.c.bf16 %v1171_v24, %v1170_v23 }
 0x2c6   : > { %1731 = vmatpush3.bf16.msra.mxu1 %v1174_v25 }
 0x2c9   : > { %1733 = vmatmul.mubr.msk.bf16.vlgmr.msra.gmra.mrb[24].mxu1 %vm889_vm10, %v1798_v26 }
 0x39c   : > { %v1225_v30 = vpop.f32.mrb[24].mxu1 }
 0x39d   : > { %v1226_v32 = vadd.f32 %v1225_v30, %v1177_v29  ;;  %v1734_v34 = vpop.f32.mrb[25].mxu1 }
 0x39e   : > { %v1228_v35 = vpop.f32.mrb[26].mxu1 }
 0x39f   : > { %v1229_v36 = vadd.f32 %v1228_v35, %v1181_v31  ;;  %v1735_v37 = vpop.f32.mrb[27].mxu1  ;;  %v1232_v38 = vmax.f32 %v1226_v32, 0.0 }
 0x3a1   : > { %v1233_v39 = vmax.f32 %v1229_v36, 0.0 }
 0x3a3   : > { %v1235_v40 = vpack.c.bf16 %v1233_v39, %v1232_v38 }
 0x3a5   : > { %1737 = vmatpush3.bf16.msra.mxu0 %v1235_v40 }
 0x3a8   : > { %1739 = vmatmul.mubr.msk.bf16.vlgmr.msra.gmra.mrb[16].mxu0 %vm889_vm10, %v1234_v41 }
 0x47b   : > { %v1277_v42 = vpop.f32.mrb[16].mxu0 }
 0x47c   : > { %v1740_v43 = vpop.f32.mrb[17].mxu0  ;;  %v1278_v44 = vadd.f32 %v1277_v42, %v1238_v28 }
 0x47d   : > { %v1280_v45 = vpop.f32.mrb[18].mxu0 }
 0x47e   : > { %1283 = vst [vmem:[%s273_s23] sm:$0xff] %v1278_v44  ;;  %v1741_v46 = vpop.f32.mrb[19].mxu0 }
 0x47f PF: > { %s17_s24 = sadd.s32 1, %s1805_s24  }
 0x480   : > { %p14_p4 = scmp.ge.s32.totalorder %s17_s24, 4  }
 0x482   :  { %16 = sbr.rel (!%p14_p4) target bundleno = 1 (0x1), region = 86 }

</bundles_post_ra>
